<compile_context>
chip_gen: v6e
topology: v6e:2x2x1
jax: 0.10.0
libtpu: 0.0.40
codegen_flags: <defaults>
</compile_context>

<pallas_src>
import functools
import math

import jax
import jax.numpy as jnp
from jax.experimental import pallas as pl
from jax.experimental.pallas import tpu as pltpu


def _round_up(a, b):
    return (a + b - 1) // b * b


def _label_smoothing_kernel(x_ref, t_ref, part_ref, *, confidence,
                            smoothing_value, pad_index, qlogq_row_const,
                            coef_mlse, tile_rows, n_valid_rows):
    # x_ref   : (tile_rows, V) float   -- raw logits row tile (tail rows of the
    #                                     last tile may be out-of-bounds garbage)
    # t_ref   : (tile_rows, 1) int32   -- target token ids for this row tile
    # part_ref: (1, 8, 128)    float32 -- per-tile partial sum (lane-dense block)
    xf = x_ref[...].astype(jnp.float32)                       # (tn, V)
    t = t_ref[...]                                             # (tn, 1)

    # Numerically-stable log_softmax pieces without materializing log_p.
    m = jnp.max(xf, axis=-1, keepdims=True)                    # (tn, 1)
    lse = jnp.log(jnp.sum(jnp.exp(xf - m), axis=-1, keepdims=True))
    mlse = m + lse                                              # (tn, 1)

    rowsum_x = jnp.sum(xf, axis=-1, keepdims=True)              # (tn, 1)

    # Single compare/select pass folds the target gather and the pad column:
    #   w = (c - s)*[id == target] - s*[id == pad]
    ids = jax.lax.broadcasted_iota(jnp.int32, xf.shape, 1)
    w = (jnp.where(ids == t, confidence - smoothing_value, 0.0)
         + jnp.where(ids == pad_index, -smoothing_value, 0.0))
    weighted = jnp.sum(w * xf, axis=-1, keepdims=True)          # (tn, 1)

    # sum_v q * log_p  =  s*rowsum(x) + sum_v(w*x) - (s*(V-2)+c)*(m+lse)
    cross = smoothing_value * rowsum_x + weighted - coef_mlse * mlse  # (tn, 1)

    # Mask pad rows and the out-of-range tail rows of a partial last tile.
    row_ids = (pl.program_id(0) * tile_rows
               + jax.lax.broadcasted_iota(jnp.int32, (tile_rows, 1), 0))
    keep = (t != pad_index) & (row_ids < n_valid_rows)           # (tn, 1)
    per_row = jnp.where(keep, qlogq_row_const - cross, 0.0)      # (tn, 1)
    partial = jnp.sum(per_row)                                   # scalar

    # Emit the partial into a full (8, 128) lane-dense block (only [0, 0] nonzero)
    # so the store is an unmasked vector store and the grid axis stays "parallel".
    rows = jax.lax.broadcasted_iota(jnp.int32, (8, 128), 0)
    cols = jax.lax.broadcasted_iota(jnp.int32, (8, 128), 1)
    part_ref[0] = jnp.where((rows == 0) & (cols == 0), partial, 0.0)


def label_smoothing_loss(outputs, targets, *, label_smoothing=0.1, pad_index=0):
    """outputs: (B, S, V) float (f32 or bf16); targets: (B, S) int. Scalar f32 loss."""
    assert 0.0 < label_smoothing <= 1.0
    B, S, V = outputs.shape
    assert V > 2, "label smoothing needs vocabulary_size > 2"
    N = B * S

    x = outputs.reshape(N, V)
    t = targets.reshape(N, 1).astype(jnp.int32)

    smoothing_value = float(label_smoothing) / (V - 2)
    confidence = 1.0 - float(label_smoothing)
    # sum_v xlogy(q, q) for a non-pad row is a compile-time constant.
    qlogq_row_const = 0.0
    if confidence > 0.0:
        qlogq_row_const += confidence * math.log(confidence)
    if smoothing_value > 0.0:
        qlogq_row_const += (V - 2) * smoothing_value * math.log(smoothing_value)
    # coefficient on (m + lse) in the collapsed cross term; algebraically == 1.0
    coef_mlse = smoothing_value * (V - 2) + confidence

    # ---- VMEM-budget-aware row tiling (per-TensorCore VMEM) ------------------
    try:
        info = pltpu.get_tpu_info()
        vmem_physical = int(getattr(info, "vmem_capacity_bytes",
                                    64 * 1024 * 1024))
    except Exception:
        vmem_physical = 64 * 1024 * 1024          # conservative (v7x per-TC) fallback
    # Clamp anything implausible (e.g. per-chip readings) into [16 MiB, 128 MiB].
    vmem_physical = max(16 * 1024 * 1024, min(vmem_physical, 128 * 1024 * 1024))
    # Leave compiler internal-scratch headroom: ~54 MiB on a 64 MiB v7x TC,
    # capped at 100 MiB on 128 MiB parts.
    vmem_limit = min(int(vmem_physical * 0.85), 100 * 1024 * 1024)
    vmem_budget = int(vmem_limit * 0.55)

    granule = 16 if x.dtype == jnp.bfloat16 else 8   # sublane packing granule
    in_bytes = jnp.dtype(x.dtype).itemsize
    # Double-buffered input tile + ~4 V-wide 32-bit temporaries (f32 cast, exp,
    # iota/weight, weighted product) after the log_p-elimination rewrite.
    per_row_bytes = 2 * V * in_bytes + 4 * V * 4
    tile_rows = vmem_budget // max(per_row_bytes, 1)
    # Byte-based cap on a single logits buffer (keeps tiles multi-MiB for small V
    # without a hard row cap; large V is already bounded by the VMEM budget).
    tile_rows = min(tile_rows, (16 * 1024 * 1024) // max(V * in_bytes, 1))
    tile_rows = max(granule, (tile_rows // granule) * granule)
    tile_rows = min(tile_rows, _round_up(N, granule))

    num_tiles = pl.cdiv(N, tile_rows)   # last block may be partial; masked in-kernel

    kernel = functools.partial(
        _label_smoothing_kernel,
        confidence=confidence,
        smoothing_value=smoothing_value,
        pad_index=int(pad_index),
        qlogq_row_const=qlogq_row_const,
        coef_mlse=coef_mlse,
        tile_rows=int(tile_rows),
        n_valid_rows=int(N),
    )

    partials = pl.pallas_call(
        kernel,
        out_shape=jax.ShapeDtypeStruct((num_tiles, 8, 128), jnp.float32),
        grid_spec=pltpu.PrefetchScalarGridSpec(
            num_scalar_prefetch=0,
            grid=(num_tiles,),
            in_specs=[
                pl.BlockSpec((tile_rows, V), lambda i: (i, 0)),
                pl.BlockSpec((tile_rows, 1), lambda i: (i, 0)),
            ],
            out_specs=pl.BlockSpec((1, 8, 128), lambda i: (i, 0, 0)),
        ),
        compiler_params=pltpu.CompilerParams(
            dimension_semantics=("parallel",),   # shards row tiles across TCs (v7x)
            vmem_limit_bytes=vmem_limit,
        ),
    )(x, t)

    # Each partial block has a single nonzero element at [i, 0, 0].
    return jnp.sum(partials)


def _reference_loss(outputs, targets, *, label_smoothing=0.1, pad_index=0):
    """Pure-JAX reference mirroring the PyTorch module."""
    B, S, V = outputs.shape
    x = outputs.reshape(B * S, V).astype(jnp.float32)
    t = targets.reshape(B * S)
    log_p = jax.nn.log_softmax(x, axis=-1)
    smoothing_value = label_smoothing / (V - 2)
    confidence = 1.0 - label_smoothing
    q = jnp.full((B * S, V), smoothing_value, jnp.float32)
    q = q.at[:, pad_index].set(0.0)
    q = q.at[jnp.arange(B * S), t].set(confidence)
    q = jnp.where((t == pad_index)[:, None], 0.0, q)
    qlogq = jnp.where(q > 0, q * jnp.log(jnp.where(q > 0, q, 1.0)), 0.0)
    return jnp.sum(qlogq - q * log_p)


if __name__ == "__main__":
    key = jax.random.PRNGKey(0)
    k1, k2 = jax.random.split(key)

    B, S, V = 2, 8, 128           # batch, seq_len, vocabulary_size (lane-dense V)
    label_smoothing = 0.1
    pad_index = 0

    outputs = jax.random.normal(k1, (B, S, V), dtype=jnp.float32)
    targets = jax.random.randint(k2, (B, S), 0, V, dtype=jnp.int32)
    # force a few pad tokens so the pad-masking path is exercised
    targets = targets.at[0, 0].set(pad_index)
    targets = targets.at[1, 3].set(pad_index)

    loss = label_smoothing_loss(outputs, targets,
                                label_smoothing=label_smoothing,
                                pad_index=pad_index)
    loss = jax.block_until_ready(loss)

    ref = _reference_loss(outputs, targets,
                          label_smoothing=label_smoothing,
                          pad_index=pad_index)
    assert jnp.allclose(loss, ref, rtol=1e-4, atol=1e-3), (loss, ref)

    print("KERNEL_OK")
</pallas_src>

<mosaic_0001>
module attributes {stable_mosaic.version = 11 : i64} {
  func.func @_label_smoothing_kernel(%arg0: i32, %arg1: memref<16x128xf32, #tpu.memory_space<vmem>>, %arg2: memref<16x1xi32, #tpu.memory_space<vmem>>, %arg3: memref<1x8x128xf32, #tpu.memory_space<vmem>>) attributes {dimension_semantics = [#tpu.dimension_semantics<parallel>], iteration_bounds = array<i64: 1>, scalar_prefetch = 0 : i64, scratch_operands = 0 : i64, tpu.core_type = #tpu.core_type<tc>, window_params = [{transform_indices = @transform_0, window_bounds = array<i64: 16, 128>}, {transform_indices = @transform_1, window_bounds = array<i64: 16, 1>}, {transform_indices = @transform_2, window_bounds = array<i64: 1, 8, 128>}]} {
    %c0 = arith.constant 0 : index
    %c0_0 = arith.constant 0 : index
    %0 = vector.load %arg1[%c0, %c0_0] : memref<16x128xf32, #tpu.memory_space<vmem>>, vector<16x128xf32>
    %c0_1 = arith.constant 0 : index
    %c0_2 = arith.constant 0 : index
    %1 = vector.load %arg2[%c0_1, %c0_2] : memref<16x1xi32, #tpu.memory_space<vmem>>, vector<16x1xi32>
    %cst = arith.constant dense<0xFF800000> : vector<16xf32>
    %2 = vector.multi_reduction <maximumf>, %0, %cst [1] : vector<16x128xf32> to vector<16xf32>
    %3 = vector.shape_cast %2 : vector<16xf32> to vector<16x1xf32>
    %4 = vector.broadcast %3 : vector<16x1xf32> to vector<16x128xf32>
    %5 = arith.subf %0, %4 : vector<16x128xf32>
    %6 = math.exp %5 : vector<16x128xf32>
    %cst_3 = arith.constant dense<0.000000e+00> : vector<16xf32>
    %7 = vector.multi_reduction <add>, %6, %cst_3 [1] : vector<16x128xf32> to vector<16xf32>
    %8 = vector.shape_cast %7 : vector<16xf32> to vector<16x1xf32>
    %9 = math.log %8 : vector<16x1xf32>
    %10 = arith.addf %3, %9 : vector<16x1xf32>
    %cst_4 = arith.constant dense<0.000000e+00> : vector<16xf32>
    %11 = vector.multi_reduction <add>, %0, %cst_4 [1] : vector<16x128xf32> to vector<16xf32>
    %12 = vector.shape_cast %11 : vector<16xf32> to vector<16x1xf32>
    %13 = tpu.iota {dimensions = array<i32: 1>} : vector<16x128xi32>
    %14 = vector.broadcast %1 : vector<16x1xi32> to vector<16x128xi32>
    %15 = arith.cmpi eq, %13, %14 : vector<16x128xi32>
    %cst_5 = arith.constant 0.89920634 : f32
    %cst_6 = arith.constant 0.000000e+00 : f32
    %16 = vector.broadcast %cst_5 : f32 to vector<16x128xf32>
    %17 = vector.broadcast %cst_6 : f32 to vector<16x128xf32>
    %18 = arith.select %15, %16, %17 : vector<16x128xi1>, vector<16x128xf32>
    %c0_i32 = arith.constant 0 : i32
    %19 = vector.broadcast %c0_i32 : i32 to vector<16x128xi32>
    %20 = arith.cmpi eq, %13, %19 : vector<16x128xi32>
    %cst_7 = arith.constant -7.93650805E-4 : f32
    %cst_8 = arith.constant 0.000000e+00 : f32
    %21 = vector.broadcast %cst_7 : f32 to vector<16x128xf32>
    %22 = vector.broadcast %cst_8 : f32 to vector<16x128xf32>
    %23 = arith.select %20, %21, %22 : vector<16x128xi1>, vector<16x128xf32>
    %24 = arith.addf %18, %23 : vector<16x128xf32>
    %25 = arith.mulf %24, %0 : vector<16x128xf32>
    %cst_9 = arith.constant dense<0.000000e+00> : vector<16xf32>
    %26 = vector.multi_reduction <add>, %25, %cst_9 [1] : vector<16x128xf32> to vector<16xf32>
    %27 = vector.shape_cast %26 : vector<16xf32> to vector<16x1xf32>
    %cst_10 = arith.constant 7.93650805E-4 : f32
    %28 = vector.broadcast %cst_10 : f32 to vector<16x1xf32>
    %29 = arith.mulf %28, %12 : vector<16x1xf32>
    %30 = arith.addf %29, %27 : vector<16x1xf32>
    %cst_11 = arith.constant 1.000000e+00 : f32
    %31 = vector.broadcast %cst_11 : f32 to vector<16x1xf32>
    %32 = arith.mulf %31, %10 : vector<16x1xf32>
    %33 = arith.subf %30, %32 : vector<16x1xf32>
    %c16_i32 = arith.constant 16 : i32
    %34 = arith.muli %arg0, %c16_i32 : i32
    %35 = tpu.iota {dimensions = array<i32: 0>} : vector<16x1xi32>
    %36 = vector.broadcast %34 : i32 to vector<16x1xi32>
    %37 = arith.addi %36, %35 : vector<16x1xi32>
    %c0_i32_12 = arith.constant 0 : i32
    %38 = vector.broadcast %c0_i32_12 : i32 to vector<16x1xi32>
    %39 = arith.cmpi ne, %1, %38 : vector<16x1xi32>
    %c16_i32_13 = arith.constant 16 : i32
    %40 = vector.broadcast %c16_i32_13 : i32 to vector<16x1xi32>
    %41 = arith.cmpi slt, %37, %40 : vector<16x1xi32>
    %42 = arith.andi %39, %41 : vector<16x1xi1>
    %cst_14 = arith.constant -0.808711171 : f32
    %43 = vector.broadcast %cst_14 : f32 to vector<16x1xf32>
    %44 = arith.subf %43, %33 : vector<16x1xf32>
    %cst_15 = arith.constant 0.000000e+00 : f32
    %45 = vector.broadcast %cst_15 : f32 to vector<16x1xf32>
    %46 = arith.select %42, %44, %45 : vector<16x1xi1>, vector<16x1xf32>
    %47 = vector.shape_cast %46 : vector<16x1xf32> to vector<1x16x1xf32>
    %cst_16 = arith.constant dense<0.000000e+00> : vector<1xf32>
    %48 = vector.multi_reduction <add>, %47, %cst_16 [1, 2] : vector<1x16x1xf32> to vector<1xf32>
    %49 = vector.shape_cast %48 : vector<1xf32> to vector<1x1x1xf32>
    %50 = vector.extract %49[0, 0, 0] : f32 from vector<1x1x1xf32>
    %51 = tpu.iota {dimensions = array<i32: 0>} : vector<8x128xi32>
    %52 = tpu.iota {dimensions = array<i32: 1>} : vector<8x128xi32>
    %c0_i32_17 = arith.constant 0 : i32
    %53 = vector.broadcast %c0_i32_17 : i32 to vector<8x128xi32>
    %54 = arith.cmpi eq, %51, %53 : vector<8x128xi32>
    %c0_i32_18 = arith.constant 0 : i32
    %55 = vector.broadcast %c0_i32_18 : i32 to vector<8x128xi32>
    %56 = arith.cmpi eq, %52, %55 : vector<8x128xi32>
    %57 = arith.andi %54, %56 : vector<8x128xi1>
    %cst_19 = arith.constant 0.000000e+00 : f32
    %58 = vector.broadcast %50 : f32 to vector<8x128xf32>
    %59 = vector.broadcast %cst_19 : f32 to vector<8x128xf32>
    %60 = arith.select %57, %58, %59 : vector<8x128xi1>, vector<8x128xf32>
    %c0_20 = arith.constant 0 : index
    %c0_21 = arith.constant 0 : index
    %c0_22 = arith.constant 0 : index
    %61 = vector.load %arg3[%c0_20, %c0_21, %c0_22] : memref<1x8x128xf32, #tpu.memory_space<vmem>>, vector<1x8x128xf32>
    %62 = vector.shape_cast %61 : vector<1x8x128xf32> to vector<8x128xf32>
    %63 = vector.shape_cast %60 : vector<8x128xf32> to vector<1x8x128xf32>
    tpu.vector_store %arg3[%c0_20, %c0_21, %c0_22], %63 {strides = array<i32>} : memref<1x8x128xf32, #tpu.memory_space<vmem>>, vector<1x8x128xf32>,
    return
  }
  func.func @transform_0(%arg0: i32) -> (i32, i32) {
    %c0_i32 = arith.constant 0 : i32
    %c0_i32_0 = arith.constant 0 : i32
    return %arg0, %c0_i32 : i32, i32
  }
  func.func @transform_1(%arg0: i32) -> (i32, i32) {
    %c0_i32 = arith.constant 0 : i32
    %c0_i32_0 = arith.constant 0 : i32
    return %arg0, %c0_i32 : i32, i32
  }
  func.func @transform_2(%arg0: i32) -> (i32, i32, i32) {
    %c0_i32 = arith.constant 0 : i32
    %c0_i32_0 = arith.constant 0 : i32
    %c0_i32_1 = arith.constant 0 : i32
    return %arg0, %c0_i32, %c0_i32_0 : i32, i32, i32
  }
}

</mosaic_0001>

<bundles_post_ra>
// kernel: tpu_custom_call.1
= control target key start
LH: loop header
LB: loop body
LE: loop exit
PB: predicated region body
PF: predicated region fallthrough
CT: control target
= control target key end

     0   :  { %v154_v2 = vmov 0   ;;  %s200_s0 = inlined_call_operand.vmem [shape: f32[16,128], index: 0, kind: input, shape index: {}]   ;;  %s201_s1 = inlined_call_operand.vmem [shape: s32[16,1], index: 1, kind: input, shape index: {}]   ;;  %s202_s2 = inlined_call_operand.hbm [shape: f32[1,8,128], index: 2, kind: output, shape index: {}]  }
   0x1   :  { %v12_v0 = vld [vmem:[%s200_s0] sm:$0xff]  ;;  %122 = vset.pattern.permute.xlu1 %v154_v2 }
   0x2   :  { %v178_v1 = vld [vmem:[%s201_s1] sm:$0xff]  ;;  %16 = vmax.xlane.f32.xlu0 %v12_v0 }
   0x3   :  { %7 = vsyncpa [#allocation3], 0  ;;  %v13_v3 = vld [vmem:[%s200_s0 + $0x8] sm:$0xff]  ;;  %43 = vperm.xlu1 %122, %v178_v1   ;;  %123 = vset.pattern.permute.xlu0 %v154_v2  ;;  %v40_v11 = vlaneseq  ;;  %v155_v16 = vmov 0.0   ;;  %vm75_vm3 = vcmp.ne.s32.totalorder %v178_v1, 0  ;;  %vm85_vm5 = vcmask 7168  }
   0x4   :  { %v15_v4 = vld [vmem:[%s201_s1 + $0x8] sm:$0xff]  ;;  %s156_s0 = smov [#allocation2]  }
   0x5   :  { %v187_v13 = vand.u32 127, %v40_v11  ;;  %vm76_vm4 = vcmp.ne.s32.totalorder %v15_v4, 0  ;;  %v70_v57 = vshrl.u32 %v40_v11, 7  ;;  %s109_s1 = sshll.u32 %s156_s0, 4  ;;  %s110_s1 = int_to_ptr.vmem [resolvable:$true] %s109_s1 }
   0x6   :  { %18 = vmax.xlane.f32.xlu0 %v13_v3  ;;  %s132_s18 = scalar_lea.vmem %s110_s1, 128  ;;  %p137_p1 = scmp.lt.s32.totalorder %s110_s1, %s110_s1 }
   0x7   :  { %46 = vperm.xlu1 %122, %v15_v4   ;;  %vm52_vm0 = vcmp.eq.s32.totalorder %v187_v13, 0  ;;  %vm98_vm6 = vcmp.eq.s32.totalorder %v70_v57, 0  ;;  %p133_p0 = scmp.ne.s32.totalorder %s110_s1, %s132_s18  ;;  %p138_p2 = scmp.lt.s32.totalorder %s132_s18, %s132_s18 }
   0x8   :  { %v53_v17 = vsel %vm52_vm0, -0.0007936508, %v155_v16  ;;  %vm99_vm7 = vmand %vm98_vm6, %vm52_vm0 }
   0x9   :  { %p139_p3 = por %p138_p2, %p137_p1 }
   0xb   :  { %p140_p4 = pnand %p139_p3, %p133_p0 }
  0x7e   :  { %v44_v12 = vpop.permute.xlu1 %43 }
  0x7f   :  { %vm48_vm1 = vcmp.eq.s32.totalorder %v187_v13, %v44_v12 }
  0x80   :  { %v50_v18 = vsel %vm48_vm1, 0.89920634, %v155_v16 }
  0x81   :  { %v54_v20 = vadd.f32 %v53_v17, %v50_v18 }
  0x82   :  { %v47_v15 = vpop.permute.xlu1 %46 }
  0x83   :  { %vm49_vm2 = vcmp.eq.s32.totalorder %v187_v13, %v47_v15  ;;  %v56_v23 = vmul.f32 %v54_v20, %v12_v0 }
  0x84   :  { %v51_v21 = vsel %vm49_vm2, 0.89920634, %v155_v16 }
  0x85   :  { %v55_v22 = vadd.f32 %v53_v17, %v51_v21 }
  0x87   :  { %v57_v24 = vmul.f32 %v55_v22, %v13_v3 }
  0x8b   :  { %v17_v5 = vpop.xlane.xlu0 %16 }
  0x8c   :  { %v20_v6 = vsub.f32 %v12_v0, %v17_v5 }
  0x8e   :  { %v22_v7 = vmul.f32 1.442695, %v20_v6 }
  0x8f   :  { %v19_v8 = vpop.xlane.xlu0 %18 }
  0x90   :  { %124 = vpow2.f32 %v22_v7  ;;  %v21_v9 = vsub.f32 %v13_v3, %v19_v8 }
  0x92   :  { %v24_v10 = vmul.f32 1.442695, %v21_v9 }
  0x94   :  { %126 = vpow2.f32 %v24_v10 }
  0x9d   :  { %v125_v14 = vpop.eup %124 }
  0x9e   :  { %26 = vadd.xlane.f32.xlu0 %v125_v14 }
  0xa1   :  { %v127_v19 = vpop.eup %126 }
  0xa2   :  { %36 = vadd.xlane.f32.xlu0 %v12_v0  ;;  %28 = vadd.xlane.f32.xlu1 %v127_v19 }
  0xa6   :  { %38 = vadd.xlane.f32.xlu0 %v13_v3 }
  0xaa   :  { %58 = vadd.xlane.f32.xlu0 %v56_v23 }
  0xae   :  { %60 = vadd.xlane.f32.xlu0 %v57_v24 }
 0x127   :  { %v27_v25 = vpop.xlane.xlu0 %26 }
 0x128   :  { %128 = vlog2.f32 %v27_v25 }
 0x12b   :  { %v29_v26 = vpop.xlane.xlu1 %28  ;;  %v37_v27 = vpop.xlane.xlu0 %36 }
 0x12c   :  { %130 = vlog2.f32 %v29_v26  ;;  %v62_v32 = vmul.f32 0.0007936508, %v37_v27 }
 0x12f   :  { %v39_v28 = vpop.xlane.xlu0 %38 }
 0x130   :  { %v63_v38 = vmul.f32 0.0007936508, %v39_v28 }
 0x133   :  { %v59_v29 = vpop.xlane.xlu0 %58 }
 0x134   :  { %v64_v34 = vadd.f32 %v62_v32, %v59_v29 }
 0x135   :  { %v129_v30 = vpop.eup %128 }
 0x136   :  { %v31_v31 = vmul.f32 0.6931472, %v129_v30 }
 0x137   :  { %v61_v36 = vpop.xlane.xlu0 %60 }
 0x138   :  { %v34_v33 = vadd.f32 %v31_v31, %v17_v5  ;;  %v65_v42 = vadd.f32 %v63_v38, %v61_v36 }
 0x139   :  { %v131_v35 = vpop.eup %130 }
 0x13a   :  { %v33_v37 = vmul.f32 0.6931472, %v131_v35  ;;  %v66_v39 = vsub.f32 %v64_v34, %v34_v33 }
 0x13c   :  { %v81_v40 = vsub.f32 -0.8087112, %v66_v39  ;;  %v35_v41 = vadd.f32 %v33_v37, %v19_v8 }
 0x13e   :  { %v67_v43 = vsub.f32 %v65_v42, %v35_v41  ;;  %v83_v45 = vsel %vm75_vm3, %v81_v40, 0.0 }
 0x13f   :  { %v86_v47 = vsel %vm85_vm5, %v83_v45, 0.0 }
 0x140   :  { %v82_v44 = vsub.f32 -0.8087112, %v67_v43 }
 0x142   :  { %v84_v46 = vsel %vm76_vm4, %v82_v44, 0.0 }
 0x143   :  { %v87_v48 = vsel %vm85_vm5, %v84_v46, 0.0 }
 0x144   :  { %v88_v49 = vadd.f32 %v87_v48, %v86_v47 }
 0x146   :  { %89 = vadd.xlane.f32.xlu0 %v88_v49 }
 0x1cf   :  { %v90_v50 = vpop.xlane.xlu0 %89 }
 0x1d0   :  { %v91_v51 = vrot.slane %v90_v50, 4 }
 0x1d2   :  { %v92_v52 = vadd.f32 %v91_v51, %v90_v50 }
 0x1d4   :  { %v93_v53 = vrot.slane %v92_v52, 2 }
 0x1d6   :  { %v94_v54 = vadd.f32 %v93_v53, %v92_v52 }
 0x1d8   :  { %v95_v55 = vrot.slane %v94_v54, 1 }
 0x1da   :  { %v96_v56 = vadd.f32 %v95_v55, %v94_v54 }
 0x1dc   :  { %117 = vpush %v96_v56 }
 0x20d   :  { %s118_s17 = spop %117 }
 0x20e   :  { %v100_v58 = vstv %s118_s17 }
 0x20f   :  { %v101_v59 = vsel %vm99_vm7, %v100_v58, 0.0 }
 0x210   :  { %102 = vst [vmem:[#allocation2] sm:$0xff] %v101_v59 }
 0x211   :  { %143 = shalt.err (!%p140_p4)
}
 0x212   :  { %112 = dma.vmem_to_hbm [thread:$0]  %s110_s1, 128, %s202_s2, [#allocation3]  }
 0x213   :  { %152 = dma.done.wait [#allocation3], 128  }
 0x214   :  { %153 = vsyncadd [#allocation3], 4294967168 }
 0x215   :  { %116 = vsyncpa [#allocation3], 1 }

</bundles_post_ra>
